<compile_context>
chip_gen: v7x
topology: tpu7x:2x2x1
jax: 0.10.0
libtpu: 0.0.40
codegen_flags: <defaults>
</compile_context>

<pallas_src>
import jax
import jax.numpy as jnp
from jax import lax
from jax.experimental import pallas as pl
from jax.experimental.pallas import tpu as pltpu


def _qkT_kernel(q_ref, k_ref, o_ref):
    # q_ref: (BH_TILE, TQ, D), k_ref: (BH_TILE, S, D), o_ref: (BH_TILE, TQ, S)
    # Batched contraction over D expressed directly via dot_general
    # (no materialized transpose / XLU relayout of the K operand).
    o_ref[...] = lax.dot_general(
        q_ref[...],
        k_ref[...],
        dimension_numbers=(((2,), (2,)), ((0,), (0,))),
        preferred_element_type=jnp.float32,
    ).astype(o_ref.dtype)


def _round_up(x, m):
    return ((x + m - 1) // m) * m


# sublane tile height by itemsize (f32 -> 8, bf16 -> 16, int8/fp8 -> 32)
_SUBLANE = {4: 8, 2: 16, 1: 32}


def _padded_block_bytes(shape, dtype):
    """VMEM footprint of one block, accounting for (sublane, 128-lane) tile padding."""
    itemsize = jnp.dtype(dtype).itemsize
    sublane = _SUBLANE.get(itemsize, 8)
    *lead, s2, s1 = shape
    n = 1
    for d in lead:
        n *= d
    return n * _round_up(max(s2, 1), sublane) * _round_up(max(s1, 1), 128) * itemsize


def _vmem_budget_and_limit():
    """Generation-aware (tiling_budget_bytes, vmem_limit_bytes)."""
    try:
        cap = int(pltpu.get_tpu_info().vmem_capacity_bytes)
    except Exception:
        cap = None
    if cap is None:
        # Unknown chip: stay conservative (fits every generation's >=64 MiB physical VMEM,
        # and the explicit limit overrides v5e's 16 MiB scoped default).
        return 28 << 20, 40 << 20
    if cap <= (80 << 20):
        # v7x-class: 64 MiB physical per TensorCore -> tighter tiles, headroom kept.
        return 40 << 20, 48 << 20
    # v5e / v6e: 128 MiB physical -> large tiles; explicit limit well above
    # the 16/32 MiB scoped-VMEM defaults.
    return 64 << 20, 80 << 20


def _divisors_desc(n, cap):
    return [d for d in range(min(n, cap), 0, -1) if n % d == 0]


def _tq_candidates(S):
    cands = []
    if S <= 512:
        cands.append(S)  # full extent is always a legal block dim
    # sublane-aligned divisors (<= 512 keeps us at/near the measured HBM-roofline plateau)
    cands += [d for d in _divisors_desc(S, 512) if d % 8 == 0 and d != S]
    if not cands:
        cands = [S]  # last resort: full extent
    return cands


def _choose_tiles(BH, S, D, in_dtype, out_dtype, vmem_budget):
    # Keep >=2 steps on the (parallel) BH grid axis so v7x's two TensorCores
    # both get work; on single-core chips the extra step costs ~0.35us (noise).
    bh_cap = min(8, BH // 2) if BH >= 2 else 1
    bh_cands = _divisors_desc(BH, bh_cap) or [1]
    tq_cands = _tq_candidates(S)

    def block_bytes(bh, tq):
        # Every operand is double-buffered by the BlockSpec pipeline; padding-aware.
        return 2 * (
            _padded_block_bytes((bh, tq, D), in_dtype)      # query tile
            + _padded_block_bytes((bh, S, D), in_dtype)     # key tile (resident over q axis)
            + _padded_block_bytes((bh, tq, S), out_dtype)   # output tile
        )

    best = None
    for bh in bh_cands:
        for tq in tq_cands:
            if block_bytes(bh, tq) > vmem_budget:
                continue
            score = (bh * tq, tq)  # fewest grid steps; tie-break on wider output stores
            if best is None or score > best[0]:
                best = (score, bh, tq)
    if best is not None:
        return best[1], best[2]
    # Nothing fits the budget (pathologically large S): smallest legal tiles, best effort.
    return 1, tq_cands[-1]


def transpose_matmul(x455, x466, *, bh_tile=None, tq=None, compute_dtype=None):
    """Equivalent of torch.matmul(x466, x455.transpose(-1, -2)).

    x455: [B, H, S, D]
    x466: [B, H, S, D]
    returns: [B, H, S, S]

    compute_dtype: optionally cast operands (e.g. jnp.bfloat16) before the MXU
    (accumulation stays f32). Default None keeps the module's exact numerics.
    """
    B, H, S, D = x455.shape
    assert x466.shape == (B, H, S, D)
    BH = B * H

    out_dtype = x466.dtype

    a = x466.reshape(BH, S, D)  # "query" side
    b = x455.reshape(BH, S, D)  # "key" side (contracted over D)
    if compute_dtype is not None:
        a = a.astype(compute_dtype)
        b = b.astype(compute_dtype)

    in_dtype = a.dtype
    in_itemsize = jnp.dtype(in_dtype).itemsize
    out_itemsize = jnp.dtype(out_dtype).itemsize

    vmem_budget, vmem_limit = _vmem_budget_and_limit()
    auto_bh, auto_tq = _choose_tiles(BH, S, D, in_dtype, out_dtype, vmem_budget)
    if bh_tile is None:
        bh_tile = auto_bh
    if tq is None:
        tq = auto_tq
    assert BH % bh_tile == 0 and S % tq == 0

    grid = (BH // bh_tile, S // tq)

    cost = pl.CostEstimate(
        flops=2 * BH * S * S * D,
        transcendentals=0,
        bytes_accessed=2 * BH * S * D * in_itemsize + BH * S * S * out_itemsize,
    )

    # TODO(synk): the big end-to-end win is fusing the scale/softmax (+ xV) consumer
    # flash-attention style so the [B, H, S, S] scores never hit HBM; kept standalone
    # here to preserve the module's exact semantics.
    out = pl.pallas_call(
        _qkT_kernel,
        out_shape=jax.ShapeDtypeStruct((BH, S, S), out_dtype),
        grid_spec=pltpu.PrefetchScalarGridSpec(
            num_scalar_prefetch=0,
            grid=grid,
            in_specs=[
                # Query tile: varies with both grid axes.
                pl.BlockSpec((bh_tile, tq, D), lambda i, q: (i, q, 0)),
                # Key tile: constant along the (sequential) q axis -> stays resident in VMEM.
                pl.BlockSpec((bh_tile, S, D), lambda i, q: (i, 0, 0)),
            ],
            out_specs=pl.BlockSpec((bh_tile, tq, S), lambda i, q: (i, q, 0)),
        ),
        compiler_params=pltpu.CompilerParams(
            # BH axis parallel (megacore sharding on v7x); q axis sequential so the
            # resident K block is not re-fetched per core.
            dimension_semantics=("parallel", "arbitrary"),
            vmem_limit_bytes=int(vmem_limit),
        ),
        cost_estimate=cost,
    )(a, b)

    return out.reshape(B, H, S, S)


if __name__ == "__main__":
    # Small shapes consistent with the module's [1, 12, 384, 64] convention.
    B, H, S, D = 1, 12, 128, 64
    key = jax.random.PRNGKey(0)
    k1, k2 = jax.random.split(key)
    x455 = jax.random.normal(k1, (B, H, S, D), dtype=jnp.float32)
    x466 = jax.random.normal(k2, (B, H, S, D), dtype=jnp.float32)

    out = transpose_matmul(x455, x466)
    out = jax.block_until_ready(out)

    # Reference check against plain JAX (module semantics: f32 matmul).
    ref = jnp.matmul(x466, jnp.swapaxes(x455, -1, -2))
    assert out.shape == (B, H, S, S)
    assert jnp.allclose(out, ref, atol=1e-4, rtol=1e-4)

    print("KERNEL_OK")
</pallas_src>

<mosaic_0001>
module attributes {stable_mosaic.version = 11 : i64} {
  func.func @_qkT_kernel(%arg0: i32, %arg1: i32, %arg2: memref<6x128x64xf32, #tpu.memory_space<vmem>>, %arg3: memref<6x128x64xf32, #tpu.memory_space<vmem>>, %arg4: memref<6x128x128xf32, #tpu.memory_space<vmem>>) attributes {dimension_semantics = [#tpu.dimension_semantics<parallel>, #tpu.dimension_semantics<arbitrary>], iteration_bounds = array<i64: 2, 1>, scalar_prefetch = 0 : i64, scratch_operands = 0 : i64, tpu.core_type = #tpu.core_type<tc>, window_params = [{transform_indices = @transform_0, window_bounds = array<i64: 6, 128, 64>}, {transform_indices = @transform_1, window_bounds = array<i64: 6, 128, 64>}, {transform_indices = @transform_2, window_bounds = array<i64: 6, 128, 128>}]} {
    %c0 = arith.constant 0 : index
    %c0_0 = arith.constant 0 : index
    %c0_1 = arith.constant 0 : index
    %0 = vector.load %arg2[%c0, %c0_0, %c0_1] : memref<6x128x64xf32, #tpu.memory_space<vmem>>, vector<6x128x64xf32>
    %c0_2 = arith.constant 0 : index
    %c0_3 = arith.constant 0 : index
    %c0_4 = arith.constant 0 : index
    %1 = vector.load %arg3[%c0_2, %c0_3, %c0_4] : memref<6x128x64xf32, #tpu.memory_space<vmem>>, vector<6x128x64xf32>
    %cst = arith.constant dense<0.000000e+00> : vector<6x128x128xf32>
    %2 = tpu.matmul %0, %1, %cst {dimension_numbers = #tpu.dot_dimension_numbers<[2], [2], [1], [1], [0, 0, 0, 1, 1, 1], [0], [0]>} : vector<6x128x64xf32>, vector<6x128x64xf32>, vector<6x128x128xf32> -> vector<6x128x128xf32>
    %c0_5 = arith.constant 0 : index
    %c0_6 = arith.constant 0 : index
    %c0_7 = arith.constant 0 : index
    %3 = vector.load %arg4[%c0_5, %c0_6, %c0_7] : memref<6x128x128xf32, #tpu.memory_space<vmem>>, vector<6x128x128xf32>
    tpu.vector_store %arg4[%c0_5, %c0_6, %c0_7], %2 {strides = array<i32>} : memref<6x128x128xf32, #tpu.memory_space<vmem>>, vector<6x128x128xf32>,
    return
  }
  func.func @transform_0(%arg0: i32, %arg1: i32) -> (i32, i32, i32) {
    %c0_i32 = arith.constant 0 : i32
    %c0_i32_0 = arith.constant 0 : i32
    return %arg0, %arg1, %c0_i32 : i32, i32, i32
  }
  func.func @transform_1(%arg0: i32, %arg1: i32) -> (i32, i32, i32) {
    %c0_i32 = arith.constant 0 : i32
    %c0_i32_0 = arith.constant 0 : i32
    %c0_i32_1 = arith.constant 0 : i32
    return %arg0, %c0_i32, %c0_i32_0 : i32, i32, i32
  }
  func.func @transform_2(%arg0: i32, %arg1: i32) -> (i32, i32, i32) {
    %c0_i32 = arith.constant 0 : i32
    %c0_i32_0 = arith.constant 0 : i32
    return %arg0, %arg1, %c0_i32 : i32, i32, i32
  }
}

</mosaic_0001>

<bundles_post_ra>
// kernel: tpu_custom_call.1
= control target key start
LH: loop header
LB: loop body
LE: loop exit
PB: predicated region body
PF: predicated region fallthrough
CT: control target
= control target key end

     0   :  { %7 = vsyncpa [#allocation3], 0  ;;  %s3939_s0 = inlined_call_operand.vmem [shape: f32[12,128,64], index: 0, kind: input, shape index: {}]   ;;  %s3940_s1 = inlined_call_operand.vmem [shape: f32[12,128,64], index: 1, kind: input, shape index: {}]   ;;  %s3941_s2 = inlined_call_operand.hbm [shape: f32[12,128,128], index: 2, kind: output, shape index: {}]  }
   0x1   :  { %9 = vsyncpa [#allocation3 + $0x1], 0  ;;  %s3229_s9 = smov 0   ;;  %s3231_s10 = smov 0  }
   0x2   :  { %s3233_s11 = smov 0   ;;  %s3235_s12 = smov 0  }
   0x3   :  { %s3237_s13 = smov 0   ;;  %s3239_s14 = smov 0  }
   0x4 LB: > { %s2047_s15 = sadd.s32 4294967295, %s3209_s14   ;;  %s2048_s16 = sadd.s32 4294967294, %s3209_s14   ;;  %s3209_s14 = sphi %s3239_s14, %s15_s14   ;;  %s3205_s13 = sphi %s3237_s13, %s3950_s13   ;;  %s3201_s12 = sphi %s3235_s12, %s3949_s12   ;;  %s3197_s11 = sphi %s3233_s11, %s3948_s11   ;;  %s3193_s10 = sphi %s3231_s10, %s3947_s10   ;;  %s3189_s9 = sphi %s3229_s9, %s3946_s9  }
   0x5   : > { %s27_s17 = sadd.s32 1, %s3205_s13  ;;  %s90_s18 = sadd.s32 1, %s3197_s11 }
   0x6   : > { %p29_p0 = scmp.ge.s32.totalorder %s27_s17, 2  ;;  %p100_p1 = scmp.ne.s32.totalorder %s3197_s11, %s3193_s10 }
   0x7   : > { %p101_p2 = scmp.eq.s32.totalorder %s2047_s15, 1  ;;  %p106_p3 = scmp.ne.s32.totalorder %s3193_s10, %s3189_s9 }
   0x8   : > { %s3952_s17 = smov (%p29_p0, %s27_s17), 0  ;;  %p107_p5 = scmp.eq.s32.totalorder %s2048_s16, 1 }
   0x9   : > { %p3269_p4 = por %p101_p2, %p100_p1  ;;  %s85_s20 = ssub.s32 %s3205_s13, %s3952_s17 }
   0xa   : > { %p2051_p6 = scmp.ge.s32.totalorder %s3209_s14, 1  ;;  %p88_p7 = scmp.eq.s32.totalorder %s85_s20, 0 }
   0xb   : > { %p3276_p8 = por %p107_p5, %p106_p3  ;;  %p150_p9 = scmp.lt.s32.totalorder %s3209_s14, 3 }
   0xc   : > { %s3282_s22 = scalar_select %p88_p7, %s3197_s11, %s90_s18  }
   0xd   : > { %p151_p10 = pnand %p2051_p6, %p150_p9 }
   0xe   : > { %s183_s23 = smul.u32 (!%p151_p10), 6, %s3201_s12  ;;  %vm396_vm0 = vcmask (!%p151_p10), 523264   ;;  %s180_s3 = sand.u32 (!%p151_p10), 1, %s3193_s10  }
   0xf   : > { %154 = sbr.rel (%p151_p10) target bundleno = 477 (0x1dd), region = 28  ;;  %vm3292_vm1 = vmpackc.low (!%p151_p10), %vm396_vm0, %vm396_vm0  ;;  %s3211_s20 = smov (!%p151_p10), [#allocation2]  }
  0x10   : > { %p185_p11 = scmp.lt.s32.totalorder (!%p151_p10), %s183_s23, 11  ;;  %s3073_s4 = smul.u32 (!%p151_p10), 768, %s180_s3 }
  0x11   : > { %s2256_s6 = smul.u32 (!%p151_p10), 12288, %s3201_s12  ;;  %s3893_s12 = scalar_lea.sflag (!%p151_p10), [#allocation3], %s180_s3 }
  0x12   : > { %s3784_s5 = scalar_lea.vmem (!%p151_p10), [#allocation2], %s3073_s4 }
  0x13   : > { %s1956_s7 = sshll.u32 (!%p151_p10), %s3784_s5, 4  ;;  %s3883_s16 = scalar_lea.hbm (!%p151_p10), %s3941_s2, %s2256_s6  ;;  %s3885_s7 = int_to_ptr.vmem [resolvable:$true] %s1956_s7 }
  0x14   : > { %s3131_s18 = scalar_lea.vmem (!%p151_p10), %s3885_s7, 12288 }
  0x15   : > { %p3132_p12 = scmp.ne.s32.totalorder (!%p151_p10), %s3885_s7, %s3131_s18 }
  0x16   : > { %s3954_s23 = smov (!%p185_p11, %s183_s23), 11 }
  0x17   : > { %s2252_s24 = sshll.u32 %s3954_s23, 7  ;;  %p3133_p13 = pnand %p3132_p12, %p3269_p4 }
  0x18   : > { %s3288_s27 = scalar_lea.vmem %s3940_s1, %s2252_s24  ;;  %s3323_s30 = scalar_lea.vmem %s3939_s0, %s2252_s24 }
  0x19   : > { %v300_v1 = vld [vmem:[%s3288_s27] sm:$0xff]  ;;  %v301_v2 = vld [vmem:[%s3288_s27 + $0x8] sm:$0xff]  ;;  %v302_v6 = vld [vmem:[%s3288_s27 + $0x10] sm:$0xff]  ;;  %p3134_p0 = pneg %p3133_p13  ;;  %s3135_s23 = sshll.u32 %s3211_s20, 4  ;;  %s3136_s23 = int_to_ptr.vmem [resolvable:$false] %s3135_s23 }
  0x1a   : > { %v316_v3 = vld [vmem:[%s3288_s27 + $0x80] sm:$0xff]  ;;  %v2785_v4 = vpack.c.bf16 %v301_v2, %v300_v1  ;;  %v317_v5 = vld [vmem:[%s3288_s27 + $0x88] sm:$0xff]  ;;  %v303_v7 = vld [vmem:[%s3288_s27 + $0x18] sm:$0xff]  ;;  %s3137_s24 = scalar_lea.vmem %s3136_s23, 24576  ;;  %p3138_p1 = scmp.lt.s32.totalorder %s3885_s7, %s3136_s23 }
  0x1b   : > { %v2833_v8 = vpack.c.bf16 %v317_v5, %v316_v3  ;;  %v2791_v9 = vpack.c.bf16 %v303_v7, %v302_v6  ;;  %v318_v10 = vld [vmem:[%s3288_s27 + $0x90] sm:$0xff]  ;;  %v319_v11 = vld [vmem:[%s3288_s27 + $0x98] sm:$0xff]  ;;  %v304_v13 = vld [vmem:[%s3288_s27 + $0x20] sm:$0xff]  ;;  %p3139_p2 = scmp.lt.s32.totalorder %s3137_s24, %s3131_s18 }
  0x1c   : > { %2787 = vmatprep.subr.msk.bf16.mxu0 %vm3292_vm1, %v2785_v4  ;;  %v2839_v12 = vpack.c.bf16 %v319_v11, %v318_v10  ;;  %v305_v14 = vld [vmem:[%s3288_s27 + $0x28] sm:$0xff]  ;;  %v320_v15 = vld [vmem:[%s3288_s27 + $0xa0] sm:$0xff]  ;;  %v306_v21 = vld [vmem:[%s3288_s27 + $0x30] sm:$0xff] }
  0x1d   : > { %2835 = vmatprep.subr.msk.bf16.mxu1 %vm3292_vm1, %v2833_v8  ;;  %2790 = vmatpush3.bf16.xpose.msk.msra.mxu0 %vm3292_vm1, %v2785_v4  ;;  %v321_v16 = vld [vmem:[%s3288_s27 + $0xa8] sm:$0xff]  ;;  %v2797_v17 = vpack.c.bf16 %v305_v14, %v304_v13  ;;  %v204_v19 = vld [vmem:[%s3323_s30] sm:$0xff]  ;;  %v307_v22 = vld [vmem:[%s3288_s27 + $0x38] sm:$0xff]  ;;  %p3140_p3 = por %p3139_p2, %p3138_p1 }
  0x1e   : > { %2838 = vmatpush3.bf16.xpose.msk.msra.mxu1 %vm3292_vm1, %v2833_v8  ;;  %2793 = vmatprep.subr.msk.bf16.mxu0 %vm3292_vm1, %v2791_v9  ;;  %v2845_v18 = vpack.c.bf16 %v321_v16, %v320_v15  ;;  %v220_v20 = vld [vmem:[%s3323_s30 + $0x80] sm:$0xff]  ;;  %v322_v23 = vld [vmem:[%s3288_s27 + $0xb0] sm:$0xff]  ;;  %v323_v24 = vld [vmem:[%s3288_s27 + $0xb8] sm:$0xff]  ;;  %v2803_v25 = vpack.c.bf16 %v307_v22, %v306_v21 }
  0x1f   : > { %2841 = vmatprep.subr.msk.bf16.mxu1 %vm3292_vm1, %v2839_v12  ;;  %2481 = vmatprep.mubr.msk.f32.mxu0 %vm396_vm0, %v204_v19  ;;  %v2851_v26 = vpack.c.bf16 %v323_v24, %v322_v23  ;;  %v308_v27 = vld [vmem:[%s3288_s27 + $0x40] sm:$0xff]  ;;  %v309_v28 = vld [vmem:[%s3288_s27 + $0x48] sm:$0xff]  ;;  %v310_v33 = vld [vmem:[%s3288_s27 + $0x50] sm:$0xff]  ;;  %p3141_p5 = pnand %p3140_p3, %p3134_p0 }
  0x20   : > { %2537 = vmatprep.mubr.msk.f32.mxu1 %vm396_vm0, %v220_v20  ;;  %v324_v29 = vld [vmem:[%s3288_s27 + $0xc0] sm:$0xff]  ;;  %v325_v30 = vld [vmem:[%s3288_s27 + $0xc8] sm:$0xff]  ;;  %v2809_v31 = vpack.c.bf16 %v309_v28, %v308_v27  ;;  %v311_v34 = vld [vmem:[%s3288_s27 + $0x58] sm:$0xff] }
  0x21   : > { %v2857_v32 = vpack.c.bf16 %v325_v30, %v324_v29  ;;  %v326_v35 = vld [vmem:[%s3288_s27 + $0xd0] sm:$0xff]  ;;  %v327_v36 = vld [vmem:[%s3288_s27 + $0xd8] sm:$0xff]  ;;  %v2815_v37 = vpack.c.bf16 %v311_v34, %v310_v33  ;;  %v312_v39 = vld [vmem:[%s3288_s27 + $0x60] sm:$0xff] }
  0x22   : > { %v2863_v38 = vpack.c.bf16 %v327_v36, %v326_v35  ;;  %v313_v40 = vld [vmem:[%s3288_s27 + $0x68] sm:$0xff]  ;;  %v328_v41 = vld [vmem:[%s3288_s27 + $0xe0] sm:$0xff]  ;;  %v314_v45 = vld [vmem:[%s3288_s27 + $0x70] sm:$0xff] }
  0x23   : > { %v329_v42 = vld [vmem:[%s3288_s27 + $0xe8] sm:$0xff]  ;;  %v2821_v43 = vpack.c.bf16 %v313_v40, %v312_v39  ;;  %v315_v46 = vld [vmem:[%s3288_s27 + $0x78] sm:$0xff]  ;;  %v330_v47 = vld [vmem:[%s3288_s27 + $0xf0] sm:$0xff] }
  0x24   : > { %v2869_v44 = vpack.c.bf16 %v329_v42, %v328_v41  ;;  %v331_v48 = vld [vmem:[%s3288_s27 + $0xf8] sm:$0xff]  ;;  %v2827_v49 = vpack.c.bf16 %v315_v46, %v314_v45  ;;  %v332_v51 = vld [vmem:[%s3288_s27 + $0x100] sm:$0xff]  ;;  %v333_v52 = vld [vmem:[%s3288_s27 + $0x108] sm:$0xff] }
  0x25   : > { %2796 = vmatpush3.bf16.xpose.msk.msra.mxu0 %vm3292_vm1, %v2791_v9  ;;  %v2875_v50 = vpack.c.bf16 %v331_v48, %v330_v47  ;;  %v348_v53 = vld [vmem:[%s3288_s27 + $0x180] sm:$0xff]  ;;  %v349_v54 = vld [vmem:[%s3288_s27 + $0x188] sm:$0xff]  ;;  %v2881_v55 = vpack.c.bf16 %v333_v52, %v332_v51  ;;  %v334_v57 = vld [vmem:[%s3288_s27 + $0x110] sm:$0xff] }
  0x26   : > { %2844 = vmatpush3.bf16.xpose.msk.msra.mxu1 %vm3292_vm1, %v2839_v12  ;;  %2799 = vmatprep.subr.msk.bf16.mxu0 %vm3292_vm1, %v2797_v17  ;;  %v2929_v56 = vpack.c.bf16 %v349_v54, %v348_v53  ;;  %v335_v58 = vld [vmem:[%s3288_s27 + $0x118] sm:$0xff]  ;;  %v350_v59 = vld [vmem:[%s3288_s27 + $0x190] sm:$0xff]  ;;  %v205_v61 = vld [vmem:[%s3323_s30 + $0x8] sm:$0xff] }
  0x27   : > { %2847 = vmatprep.subr.msk.bf16.mxu1 %vm3292_vm1, %v2845_v18  ;;  %v351_v60 = vld [vmem:[%s3288_s27 + $0x198] sm:$0xff]  ;;  %v221_v62 = vld [vmem:[%s3323_s30 + $0x88] sm:$0xff]  ;;  %v2887_v63 = vpack.c.bf16 %v335_v58, %v334_v57  ;;  %v206_v2 = vld [vmem:[%s3323_s30 + $0x10] sm:$0xff] }
  0x28   : > { %v2935_v1 = vpack.c.bf16 %v351_v60, %v350_v59  ;;  %v222_v3 = vld [vmem:[%s3323_s30 + $0x90] sm:$0xff]  ;;  %v207_v4 = vld [vmem:[%s3323_s30 + $0x18] sm:$0xff]  ;;  %v208_v6 = vld [vmem:[%s3323_s30 + $0x20] sm:$0xff] }
  0x29   : > { %v223_v5 = vld [vmem:[%s3323_s30 + $0x98] sm:$0xff]  ;;  %v336_v7 = vld [vmem:[%s3288_s27 + $0x120] sm:$0xff]  ;;  %v337_v8 = vld [vmem:[%s3288_s27 + $0x128] sm:$0xff] }
  0x2a   : > { %v224_v9 = vld [vmem:[%s3323_s30 + $0xa0] sm:$0xff]  ;;  %v353_v11 = vld [vmem:[%s3288_s27 + $0x1a8] sm:$0xff]  ;;  %v2893_v13 = vpack.c.bf16 %v337_v8, %v336_v7  ;;  %v210_v16 = vld [vmem:[%s3323_s30 + $0x30] sm:$0xff] }
  0x2b   : > { %v352_v10 = vld [vmem:[%s3288_s27 + $0x1a0] sm:$0xff]  ;;  %v209_v12 = vld [vmem:[%s3323_s30 + $0x28] sm:$0xff]  ;;  %v227_v19 = vld [vmem:[%s3323_s30 + $0xb8] sm:$0xff] }
  0x2c   : > { %v225_v14 = vld [vmem:[%s3323_s30 + $0xa8] sm:$0xff]  ;;  %v2941_v15 = vpack.c.bf16 %v353_v11, %v352_v10  ;;  %v212_v20 = vld [vmem:[%s3323_s30 + $0x40] sm:$0xff]  ;;  %v338_v21 = vld [vmem:[%s3288_s27 + $0x130] sm:$0xff] }
  0x2d   : > { %2802 = vmatpush3.bf16.xpose.msk.msra.mxu0 %vm3292_vm1, %v2797_v17  ;;  %v226_v17 = vld [vmem:[%s3323_s30 + $0xb0] sm:$0xff]  ;;  %v339_v22 = vld [vmem:[%s3288_s27 + $0x138] sm:$0xff]  ;;  %v228_v23 = vld [vmem:[%s3323_s30 + $0xc0] sm:$0xff] }
  0x2e   : > { %2850 = vmatpush3.bf16.xpose.msk.msra.mxu1 %vm3292_vm1, %v2845_v18  ;;  %2805 = vmatprep.subr.msk.bf16.mxu0 %vm3292_vm1, %v2803_v25  ;;  %v211_v18 = vld [vmem:[%s3323_s30 + $0x38] sm:$0xff]  ;;  %v354_v24 = vld [vmem:[%s3288_s27 + $0x1b0] sm:$0xff]  ;;  %v2899_v27 = vpack.c.bf16 %v339_v22, %v338_v21  ;;  %v229_v28 = vld [vmem:[%s3323_s30 + $0xc8] sm:$0xff] }
  0x2f   : > { %2853 = vmatprep.subr.msk.bf16.mxu1 %vm3292_vm1, %v2851_v26  ;;  %v214_v30 = vld [vmem:[%s3323_s30 + $0x50] sm:$0xff]  ;;  %v231_v33 = vld [vmem:[%s3323_s30 + $0xd8] sm:$0xff]  ;;  %v216_v34 = vld [vmem:[%s3323_s30 + $0x60] sm:$0xff] }
  0x30   : > { %v340_v35 = vld [vmem:[%s3288_s27 + $0x140] sm:$0xff]  ;;  %v341_v36 = vld [vmem:[%s3288_s27 + $0x148] sm:$0xff]  ;;  %v234_v45 = vld [vmem:[%s3323_s30 + $0xf0] sm:$0xff] }
  0x31   : > { %v357_v39 = vld [vmem:[%s3288_s27 + $0x1c8] sm:$0xff]  ;;  %v2905_v41 = vpack.c.bf16 %v341_v36, %v340_v35  ;;  %v219_v46 = vld [vmem:[%s3323_s30 + $0x78] sm:$0xff]  ;;  %v236_v48 = vld [vmem:[%s3323_s30 + $0x100] sm:$0xff] }
  0x32   : > { %v217_v40 = vld [vmem:[%s3323_s30 + $0x68] sm:$0xff]  ;;  %v235_v47 = vld [vmem:[%s3323_s30 + $0xf8] sm:$0xff]  ;;  %v252_v51 = vld [vmem:[%s3323_s30 + $0x180] sm:$0xff] }
  0x33   : > { %v233_v42 = vld [vmem:[%s3323_s30 + $0xe8] sm:$0xff]  ;;  %v358_v52 = vld [vmem:[%s3288_s27 + $0x1d0] sm:$0xff]  ;;  %v359_v53 = vld [vmem:[%s3288_s27 + $0x1d8] sm:$0xff] }
  0x34   : > { %v345_v57 = vld [vmem:[%s3288_s27 + $0x168] sm:$0xff]  ;;  %v360_v58 = vld [vmem:[%s3288_s27 + $0x1e0] sm:$0xff]  ;;  %v366_v11 = vld [vmem:[%s3288_s27 + $0x210] sm:$0xff] }
  0x35   : > { %2808 = vmatpush3.bf16.xpose.msk.msra.mxu0 %vm3292_vm1, %v2803_v25  ;;  %v355_v25 = vld [vmem:[%s3288_s27 + $0x1b8] sm:$0xff]  ;;  %v361_v59 = vld [vmem:[%s3288_s27 + $0x1e8] sm:$0xff]  ;;  %v380_v7 = vld [vmem:[%s3288_s27 + $0x280] sm:$0xff] }
  0x36   : > { %2856 = vmatpush3.bf16.xpose.msk.msra.mxu1 %vm3292_vm1, %v2851_v26  ;;  %2811 = vmatprep.subr.msk.bf16.mxu0 %vm3292_vm1, %v2809_v31  ;;  %v213_v26 = vld [vmem:[%s3323_s30 + $0x48] sm:$0xff]  ;;  %v2947_v29 = vpack.c.bf16 %v355_v25, %v354_v24  ;;  %v239_v21 = vld [vmem:[%s3323_s30 + $0x118] sm:$0xff]  ;;  %v368_v24 = vld [vmem:[%s3288_s27 + $0x220] sm:$0xff] }
  0x37   : > { %2859 = vmatprep.subr.msk.bf16.mxu1 %vm3292_vm1, %v2857_v32  ;;  %v381_v8 = vld [vmem:[%s3288_s27 + $0x288] sm:$0xff]  ;;  %v255_v22 = vld [vmem:[%s3323_s30 + $0x198] sm:$0xff] }
  0x38   : > { %v3025_v10 = vpack.c.bf16 %v381_v8, %v380_v7  ;;  %v369_v25 = vld [vmem:[%s3288_s27 + $0x228] sm:$0xff]  ;;  %v243_v35 = vld [vmem:[%s3323_s30 + $0x138] sm:$0xff] }
  0x39   : > { %v259_v36 = vld [vmem:[%s3323_s30 + $0x1b8] sm:$0xff] }
  0x3a   : > { %v391_v7 = vld [vmem:[%s3288_s27 + $0x2d8] sm:$0xff] }
  0x3b   : > { %v287_v0 = vld [vmem:[%s3323_s30 + $0x298] sm:$0xff] }
  0x3d   : > { %2814 = vmatpush3.bf16.xpose.msk.msra.mxu0 %vm3292_vm1, %v2809_v31  ;;  %v230_v31 = vld [vmem:[%s3323_s30 + $0xd0] sm:$0xff] }
  0x3e   : > { %2862 = vmatpush3.bf16.xpose.msk.msra.mxu1 %vm3292_vm1, %v2857_v32  ;;  %2817 = vmatprep.subr.msk.bf16.mxu0 %vm3292_vm1, %v2815_v37  ;;  %v215_v32 = vld [vmem:[%s3323_s30 + $0x58] sm:$0xff] }
  0x3f   : > { %2865 = vmatprep.subr.msk.bf16.mxu1 %vm3292_vm1, %v2863_v38 }
  0x45   : > { %2820 = vmatpush3.bf16.xpose.msk.msra.mxu0 %vm3292_vm1, %v2815_v37  ;;  %v232_v37 = vld [vmem:[%s3323_s30 + $0xe0] sm:$0xff] }
  0x46   : > { %2868 = vmatpush3.bf16.xpose.msk.msra.mxu1 %vm3292_vm1, %v2863_v38  ;;  %2823 = vmatprep.subr.msk.bf16.mxu0 %vm3292_vm1, %v2821_v43  ;;  %v356_v38 = vld [vmem:[%s3288_s27 + $0x1c0] sm:$0xff] }
  0x47   : > { %2871 = vmatprep.subr.msk.bf16.mxu1 %vm3292_vm1, %v2869_v44 }
  0x4d   : > { %2826 = vmatpush3.bf16.xpose.msk.msra.mxu0 %vm3292_vm1, %v2821_v43  ;;  %v2953_v43 = vpack.c.bf16 %v357_v39, %v356_v38  ;;  %v370_v38 = vld [vmem:[%s3288_s27 + $0x230] sm:$0xff]  ;;  %v371_v39 = vld [vmem:[%s3288_s27 + $0x238] sm:$0xff] }
  0x4e   : > { %2874 = vmatpush3.bf16.xpose.msk.msra.mxu1 %vm3292_vm1, %v2869_v44  ;;  %2829 = vmatprep.subr.msk.bf16.mxu0 %vm3292_vm1, %v2827_v49  ;;  %v218_v44 = vld [vmem:[%s3323_s30 + $0x70] sm:$0xff] }
  0x4f   : > { %2877 = vmatprep.subr.msk.bf16.mxu1 %vm3292_vm1, %v2875_v50 }
  0x55   : > { %2832 = vmatpush3.bf16.xpose.msk.msra.mxu0 %vm3292_vm1, %v2827_v49  ;;  %v342_v49 = vld [vmem:[%s3288_s27 + $0x150] sm:$0xff] }
  0x56   : > { %2880 = vmatpush3.bf16.xpose.msk.msra.mxu1 %vm3292_vm1, %v2875_v50  ;;  %2883 = vmatprep.subr.msk.bf16.mxu0 %vm3292_vm1, %v2881_v55  ;;  %v343_v50 = vld [vmem:[%s3288_s27 + $0x158] sm:$0xff] }
  0x57   : > { %2931 = vmatprep.subr.msk.bf16.mxu1 %vm3292_vm1, %v2929_v56  ;;  %v2911_v54 = vpack.c.bf16 %v343_v50, %v342_v49  ;;  %v247_v49 = vld [vmem:[%s3323_s30 + $0x158] sm:$0xff] }
  0x58   : > { %v263_v50 = vld [vmem:[%s3323_s30 + $0x1d8] sm:$0xff] }
  0x5c   : > { %2482 = vmatmul.mubr.msk.f32.vlgmr.msra.gmra.mrb[0].mxu0 %vm396_vm0, %v205_v61  ;;  %v2965_v61 = vpack.c.bf16 %v361_v59, %v360_v58  ;;  %v265_v59 = vld [vmem:[%s3323_s30 + $0x1e8] sm:$0xff] }
  0x5d   : > { %2538 = vmatmul.mubr.msk.f32.vlgmr.msra.gmra.mrb[0].mxu1 %vm396_vm0, %v221_v62  ;;  %2886 = vmatpush3.bf16.xpose.msk.msra.mxu0 %vm3292_vm1, %v2881_v55  ;;  %v2959_v55 = vpack.c.bf16 %v359_v53, %v358_v52  ;;  %v346_v62 = vld [vmem:[%s3288_s27 + $0x170] sm:$0xff]  ;;  %v372_v52 = vld [vmem:[%s3288_s27 + $0x240] sm:$0xff]  ;;  %v373_v53 = vld [vmem:[%s3288_s27 + $0x248] sm:$0xff] }
  0x5e   : > { %2934 = vmatpush3.bf16.xpose.msk.msra.mxu1 %vm3292_vm1, %v2929_v56  ;;  %2889 = vmatprep.subr.msk.bf16.mxu0 %vm3292_vm1, %v2887_v63  ;;  %v344_v56 = vld [vmem:[%s3288_s27 + $0x160] sm:$0xff]  ;;  %v3001_v58 = vpack.c.bf16 %v373_v53, %v372_v52 }
  0x5f   : > { %2937 = vmatprep.subr.msk.bf16.mxu1 %vm3292_vm1, %v2935_v1  ;;  %2484 = vmatprep.mubr.msk.f32.mxu0 %vm396_vm0, %v206_v2  ;;  %v2917_v60 = vpack.c.bf16 %v345_v57, %v344_v56  ;;  %v363_v2 = vld [vmem:[%s3288_s27 + $0x1f8] sm:$0xff]  ;;  %v389_v56 = vld [vmem:[%s3288_s27 + $0x2c8] sm:$0xff] }
  0x60   : > { %2540 = vmatprep.mubr.msk.f32.mxu1 %vm396_vm0, %v222_v3  ;;  %2485 = vmatmul.mubr.msk.f32.gmra.mrb[2].mxu0 %vm396_vm0, %v207_v4  ;;  %v249_v57 = vld [vmem:[%s3323_s30 + $0x168] sm:$0xff] }
  0x61   : > { %2541 = vmatmul.mubr.msk.f32.gmra.mrb[2].mxu1 %vm396_vm0, %v223_v5  ;;  %2487 = vmatprep.mubr.msk.f32.mxu0 %vm396_vm0, %v208_v6  ;;  %v364_v5 = vld [vmem:[%s3288_s27 + $0x200] sm:$0xff]  ;;  %v365_v6 = vld [vmem:[%s3288_s27 + $0x208] sm:$0xff] }
  0x62   : > { %2543 = vmatprep.mubr.msk.f32.mxu1 %vm396_vm0, %v224_v9  ;;  %v2977_v9 = vpack.c.bf16 %v365_v6, %v364_v5  ;;  %v284_v5 = vld [vmem:[%s3323_s30 + $0x280] sm:$0xff]  ;;  %v390_v6 = vld [vmem:[%s3288_s27 + $0x2d0] sm:$0xff] }
  0x64   : > { %2488 = vmatmul.mubr.msk.f32.gmra.mrb[4].mxu0 %vm396_vm0, %v209_v12  ;;  %v367_v12 = vld [vmem:[%s3288_s27 + $0x218] sm:$0xff] }
  0x65   : > { %2892 = vmatpush3.bf16.xpose.msk.msra.mxu0 %vm3292_vm1, %v2887_v63  ;;  %2544 = vmatmul.mubr.msk.f32.gmra.mrb[4].mxu1 %vm396_vm0, %v225_v14  ;;  %v347_v63 = vld [vmem:[%s3288_s27 + $0x178] sm:$0xff] }
  0x66   : > { %2940 = vmatpush3.bf16.xpose.msk.msra.mxu1 %vm3292_vm1, %v2935_v1  ;;  %2895 = vmatprep.subr.msk.bf16.mxu0 %vm3292_vm1, %v2893_v13  ;;  %v362_v1 = vld [vmem:[%s3288_s27 + $0x1f0] sm:$0xff]  ;;  %v2923_v3 = vpack.c.bf16 %v347_v63, %v346_v62  ;;  %v383_v14 = vld [vmem:[%s3288_s27 + $0x298] sm:$0xff] }
  0x67   : > { %2943 = vmatprep.subr.msk.bf16.mxu1 %vm3292_vm1, %v2941_v15  ;;  %2490 = vmatprep.mubr.msk.f32.mxu0 %vm396_vm0, %v210_v16  ;;  %v2971_v4 = vpack.c.bf16 %v363_v2, %v362_v1  ;;  %v253_v16 = vld [vmem:[%s3323_s30 + $0x188] sm:$0xff]  ;;  %v266_v62 = vld [vmem:[%s3323_s30 + $0x1f0] sm:$0xff]  ;;  %v251_v63 = vld [vmem:[%s3323_s30 + $0x178] sm:$0xff] }
  0x68   : > { %2546 = vmatprep.mubr.msk.f32.mxu1 %vm396_vm0, %v226_v17  ;;  %2491 = vmatmul.mubr.msk.f32.gmra.mrb[6].mxu0 %vm396_vm0, %v211_v18  ;;  %v2983_v17 = vpack.c.bf16 %v367_v12, %v366_v11  ;;  %v267_v1 = vld [vmem:[%s3323_s30 + $0x1f8] sm:$0xff]  ;;  %v268_v2 = vld [vmem:[%s3323_s30 + $0x200] sm:$0xff]  ;;  %v377_v11 = vld [vmem:[%s3288_s27 + $0x268] sm:$0xff] }
  0x69   : > { %2547 = vmatmul.mubr.msk.f32.gmra.mrb[6].mxu1 %vm396_vm0, %v227_v19  ;;  %2493 = vmatprep.mubr.msk.f32.mxu0 %vm396_vm0, %v212_v20  ;;  %v238_v19 = vld [vmem:[%s3323_s30 + $0x110] sm:$0xff]  ;;  %v392_v12 = vld [vmem:[%s3288_s27 + $0x2e0] sm:$0xff] }
  0x6a   : > { %2549 = vmatprep.mubr.msk.f32.mxu1 %vm396_vm0, %v228_v23  ;;  %v254_v20 = vld [vmem:[%s3323_s30 + $0x190] sm:$0xff]  ;;  %v240_v23 = vld [vmem:[%s3323_s30 + $0x120] sm:$0xff] }
  0x6c   : > { %2494 = vmatmul.mubr.msk.f32.gmra.mrb[8].mxu0 %vm396_vm0, %v213_v26  ;;  %v256_v26 = vld [vmem:[%s3323_s30 + $0x1a0] sm:$0xff] }
  0x6d   : > { %2898 = vmatpush3.bf16.xpose.msk.msra.mxu0 %vm3292_vm1, %v2893_v13  ;;  %2550 = vmatmul.mubr.msk.f32.gmra.mrb[8].mxu1 %vm396_vm0, %v229_v28  ;;  %v382_v13 = vld [vmem:[%s3288_s27 + $0x290] sm:$0xff]  ;;  %v385_v28 = vld [vmem:[%s3288_s27 + $0x2a8] sm:$0xff] }
  0x6e   : > { %2946 = vmatpush3.bf16.xpose.msk.msra.mxu1 %vm3292_vm1, %v2941_v15  ;;  %2901 = vmatprep.subr.msk.bf16.mxu0 %vm3292_vm1, %v2899_v27  ;;  %v237_v15 = vld [vmem:[%s3323_s30 + $0x108] sm:$0xff]  ;;  %v3031_v18 = vpack.c.bf16 %v383_v14, %v382_v13 }
  0x6f   : > { %2949 = vmatprep.subr.msk.bf16.mxu1 %vm3292_vm1, %v2947_v29  ;;  %2496 = vmatprep.mubr.msk.f32.mxu0 %vm396_vm0, %v214_v30  ;;  %v2989_v30 = vpack.c.bf16 %v369_v25, %v368_v24  ;;  %v393_v13 = vld [vmem:[%s3288_s27 + $0x2e8] sm:$0xff]  ;;  %v270_v24 = vld [vmem:[%s3323_s30 + $0x210] sm:$0xff] }
  0x70   : > { %2552 = vmatprep.mubr.msk.f32.mxu1 %vm396_vm0, %v230_v31  ;;  %2497 = vmatmul.mubr.msk.f32.gmra.mrb[10].mxu0 %vm396_vm0, %v215_v32  ;;  %v257_v31 = vld [vmem:[%s3323_s30 + $0x1a8] sm:$0xff]  ;;  %v286_v25 = vld [vmem:[%s3323_s30 + $0x290] sm:$0xff] }
  0x71   : > { %2553 = vmatmul.mubr.msk.f32.gmra.mrb[10].mxu1 %vm396_vm0, %v231_v33  ;;  %2499 = vmatprep.mubr.msk.f32.mxu0 %vm396_vm0, %v216_v34  ;;  %v242_v33 = vld [vmem:[%s3323_s30 + $0x130] sm:$0xff] }
  0x72   : > { %2555 = vmatprep.mubr.msk.f32.mxu1 %vm396_vm0, %v232_v37  ;;  %v258_v34 = vld [vmem:[%s3323_s30 + $0x1b0] sm:$0xff]  ;;  %v244_v37 = vld [vmem:[%s3323_s30 + $0x140] sm:$0xff] }
  0x74   : > { %2500 = vmatmul.mubr.msk.f32.gmra.mrb[12].mxu0 %vm396_vm0, %v217_v40  ;;  %v260_v40 = vld [vmem:[%s3323_s30 + $0x1c0] sm:$0xff] }
  0x75   : > { %2904 = vmatpush3.bf16.xpose.msk.msra.mxu0 %vm3292_vm1, %v2899_v27  ;;  %2556 = vmatmul.mubr.msk.f32.gmra.mrb[12].mxu1 %vm396_vm0, %v233_v42  ;;  %v384_v27 = vld [vmem:[%s3288_s27 + $0x2a0] sm:$0xff]  ;;  %v387_v42 = vld [vmem:[%s3288_s27 + $0x2b8] sm:$0xff] }
  0x76   : > { %2952 = vmatpush3.bf16.xpose.msk.msra.mxu1 %vm3292_vm1, %v2947_v29  ;;  %2907 = vmatprep.subr.msk.bf16.mxu0 %vm3292_vm1, %v2905_v41  ;;  %v241_v29 = vld [vmem:[%s3323_s30 + $0x128] sm:$0xff]  ;;  %v3037_v32 = vpack.c.bf16 %v385_v28, %v384_v27  ;;  %v272_v27 = vld [vmem:[%s3323_s30 + $0x220] sm:$0xff] }
  0x77   : > { %2955 = vmatprep.subr.msk.bf16.mxu1 %vm3292_vm1, %v2953_v43  ;;  %2502 = vmatprep.mubr.msk.f32.mxu0 %vm396_vm0, %v218_v44  ;;  %v2995_v44 = vpack.c.bf16 %v371_v39, %v370_v38  ;;  %v288_v28 = vld [vmem:[%s3323_s30 + $0x2a0] sm:$0xff]  ;;  %v293_v38 = vld [vmem:[%s3323_s30 + $0x2c8] sm:$0xff]  ;;  %v278_v39 = vld [vmem:[%s3323_s30 + $0x250] sm:$0xff] }
  0x78   : > { %2558 = vmatprep.mubr.msk.f32.mxu1 %vm396_vm0, %v234_v45  ;;  %2503 = vmatmul.mubr.msk.f32.gmra.mrb[14].mxu0 %vm396_vm0, %v219_v46  ;;  %v261_v45 = vld [vmem:[%s3323_s30 + $0x1c8] sm:$0xff] }
  0x79   : > { %2559 = vmatmul.mubr.msk.f32.gmra.mrb[14].mxu1 %vm396_vm0, %v235_v47  ;;  %2593 = vmatprep.mubr.msk.f32.mxu0 %vm396_vm0, %v236_v48  ;;  %v246_v47 = vld [vmem:[%s3323_s30 + $0x150] sm:$0xff] }
  0x7a   : > { %2649 = vmatprep.mubr.msk.f32.mxu1 %vm396_vm0, %v252_v51  ;;  %v262_v48 = vld [vmem:[%s3323_s30 + $0x1d0] sm:$0xff]  ;;  %v248_v51 = vld [vmem:[%s3323_s30 + $0x160] sm:$0xff] }
  0x7d   : > { %2910 = vmatpush3.bf16.xpose.msk.msra.mxu0 %vm3292_vm1, %v2905_v41  ;;  %v386_v41 = vld [vmem:[%s3288_s27 + $0x2b0] sm:$0xff] }
  0x7e   : > { %2958 = vmatpush3.bf16.xpose.msk.msra.mxu1 %vm3292_vm1, %v2953_v43  ;;  %2913 = vmatprep.subr.msk.bf16.mxu0 %vm3292_vm1, %v2911_v54  ;;  %v245_v43 = vld [vmem:[%s3323_s30 + $0x148] sm:$0xff]  ;;  %v3043_v46 = vpack.c.bf16 %v387_v42, %v386_v41  ;;  %v279_v41 = vld [vmem:[%s3323_s30 + $0x258] sm:$0xff] }
  0x7f   : > { %2961 = vmatprep.subr.msk.bf16.mxu1 %vm3292_vm1, %v2959_v55  ;;  %v295_v42 = vld [vmem:[%s3323_s30 + $0x2d8] sm:$0xff] }
  0x85   : > { %2916 = vmatpush3.bf16.xpose.msk.msra.mxu0 %vm3292_vm1, %v2911_v54  ;;  %v264_v54 = vld [vmem:[%s3323_s30 + $0x1e0] sm:$0xff] }
  0x86   : > { %2964 = vmatpush3.bf16.xpose.msk.msra.mxu1 %vm3292_vm1, %v2959_v55  ;;  %2919 = vmatprep.subr.msk.bf16.mxu0 %vm3292_vm1, %v2917_v60  ;;  %v388_v55 = vld [vmem:[%s3288_s27 + $0x2c0] sm:$0xff] }
  0x87   : > { %2967 = vmatprep.subr.msk.bf16.mxu1 %vm3292_vm1, %v2965_v61 }
  0x8d   : > { %2922 = vmatpush3.bf16.xpose.msk.msra.mxu0 %vm3292_vm1, %v2917_v60  ;;  %v3049_v60 = vpack.c.bf16 %v389_v56, %v388_v55 }
  0x8e   : > { %2970 = vmatpush3.bf16.xpose.msk.msra.mxu1 %vm3292_vm1, %v2965_v61  ;;  %2925 = vmatprep.subr.msk.bf16.mxu0 %vm3292_vm1, %v2923_v3  ;;  %v250_v61 = vld [vmem:[%s3323_s30 + $0x170] sm:$0xff] }
  0x8f   : > { %2973 = vmatprep.subr.msk.bf16.mxu1 %vm3292_vm1, %v2971_v4 }
  0x95   : > { %2928 = vmatpush3.bf16.xpose.msk.msra.mxu0 %vm3292_vm1, %v2923_v3  ;;  %v374_v3 = vld [vmem:[%s3288_s27 + $0x250] sm:$0xff] }
  0x96   : > { %2976 = vmatpush3.bf16.xpose.msk.msra.mxu1 %vm3292_vm1, %v2971_v4  ;;  %2979 = vmatprep.subr.msk.bf16.mxu0 %vm3292_vm1, %v2977_v9  ;;  %v375_v4 = vld [vmem:[%s3288_s27 + $0x258] sm:$0xff] }
  0x97   : > { %3027 = vmatprep.subr.msk.bf16.mxu1 %vm3292_vm1, %v3025_v10  ;;  %v3007_v8 = vpack.c.bf16 %v375_v4, %v374_v3 }
  0x9c   : > { %2594 = vmatmul.mubr.msk.f32.vlgmr.msra.gmra.mrb[16].mxu0 %vm396_vm0, %v237_v15  ;;  %v3061_v15 = vpack.c.bf16 %v393_v13, %v392_v12 }
  0x9d   : > { %2650 = vmatmul.mubr.msk.f32.vlgmr.msra.gmra.mrb[16].mxu1 %vm396_vm0, %v253_v16  ;;  %2982 = vmatpush3.bf16.xpose.msk.msra.mxu0 %vm3292_vm1, %v2977_v9  ;;  %v3055_v9 = vpack.c.bf16 %v391_v7, %v390_v6  ;;  %v378_v16 = vld [vmem:[%s3288_s27 + $0x270] sm:$0xff] }
  0x9e   : > { %3030 = vmatpush3.bf16.xpose.msk.msra.mxu1 %vm3292_vm1, %v3025_v10  ;;  %2985 = vmatprep.subr.msk.bf16.mxu0 %vm3292_vm1, %v2983_v17  ;;  %v376_v10 = vld [vmem:[%s3288_s27 + $0x260] sm:$0xff] }
  0x9f   : > { %3033 = vmatprep.subr.msk.bf16.mxu1 %vm3292_vm1, %v3031_v18  ;;  %2596 = vmatprep.mubr.msk.f32.mxu0 %vm396_vm0, %v238_v19  ;;  %v3013_v14 = vpack.c.bf16 %v377_v11, %v376_v10  ;;  %v395_v19 = vld [vmem:[%s3288_s27 + $0x2f8] sm:$0xff] }
  0xa0   : > { %2652 = vmatprep.mubr.msk.f32.mxu1 %vm396_vm0, %v254_v20  ;;  %2597 = vmatmul.mubr.msk.f32.gmra.mrb[18].mxu0 %vm396_vm0, %v239_v21 }
  0xa1   : > { %2653 = vmatmul.mubr.msk.f32.gmra.mrb[18].mxu1 %vm396_vm0, %v255_v22  ;;  %2599 = vmatprep.mubr.msk.f32.mxu0 %vm396_vm0, %v240_v23  ;;  %v269_v22 = vld [vmem:[%s3323_s30 + $0x208] sm:$0xff] }
  0xa2   : > { %2655 = vmatprep.mubr.msk.f32.mxu1 %vm396_vm0, %v256_v26  ;;  %v285_v23 = vld [vmem:[%s3323_s30 + $0x288] sm:$0xff]  ;;  %v271_v26 = vld [vmem:[%s3323_s30 + $0x218] sm:$0xff] }
  0xa4   : > { %2600 = vmatmul.mubr.msk.f32.gmra.mrb[20].mxu0 %vm396_vm0, %v241_v29  ;;  %v273_v29 = vld [vmem:[%s3323_s30 + $0x228] sm:$0xff] }
  0xa5   : > { %2988 = vmatpush3.bf16.xpose.msk.msra.mxu0 %vm3292_vm1, %v2983_v17  ;;  %2656 = vmatmul.mubr.msk.f32.gmra.mrb[20].mxu1 %vm396_vm0, %v257_v31  ;;  %v379_v17 = vld [vmem:[%s3288_s27 + $0x278] sm:$0xff]  ;;  %v274_v31 = vld [vmem:[%s3323_s30 + $0x230] sm:$0xff] }
  0xa6   : > { %3036 = vmatpush3.bf16.xpose.msk.msra.mxu1 %vm3292_vm1, %v3031_v18  ;;  %2991 = vmatprep.subr.msk.bf16.mxu0 %vm3292_vm1, %v2989_v30  ;;  %v394_v18 = vld [vmem:[%s3288_s27 + $0x2f0] sm:$0xff]  ;;  %v3019_v20 = vpack.c.bf16 %v379_v17, %v378_v16 }
  0xa7   : > { %3039 = vmatprep.subr.msk.bf16.mxu1 %vm3292_vm1, %v3037_v32  ;;  %2602 = vmatprep.mubr.msk.f32.mxu0 %vm396_vm0, %v242_v33  ;;  %v3067_v21 = vpack.c.bf16 %v395_v19, %v394_v18  ;;  %v275_v33 = vld [vmem:[%s3323_s30 + $0x238] sm:$0xff] }
  0xa8   : > { %2658 = vmatprep.mubr.msk.f32.mxu1 %vm396_vm0, %v258_v34  ;;  %2603 = vmatmul.mubr.msk.f32.gmra.mrb[22].mxu0 %vm396_vm0, %v243_v35  ;;  %v291_v34 = vld [vmem:[%s3323_s30 + $0x2b8] sm:$0xff]  ;;  %v276_v35 = vld [vmem:[%s3323_s30 + $0x240] sm:$0xff] }
  0xa9   : > { %2659 = vmatmul.mubr.msk.f32.gmra.mrb[22].mxu1 %vm396_vm0, %v259_v36  ;;  %2605 = vmatprep.mubr.msk.f32.mxu0 %vm396_vm0, %v244_v37  ;;  %v292_v36 = vld [vmem:[%s3323_s30 + $0x2c0] sm:$0xff]  ;;  %v277_v37 = vld [vmem:[%s3323_s30 + $0x248] sm:$0xff] }
  0xaa   : > { %2661 = vmatprep.mubr.msk.f32.mxu1 %vm396_vm0, %v260_v40  ;;  %v294_v40 = vld [vmem:[%s3323_s30 + $0x2d0] sm:$0xff] }
  0xac   : > { %2606 = vmatmul.mubr.msk.f32.gmra.mrb[24].mxu0 %vm396_vm0, %v245_v43  ;;  %v280_v43 = vld [vmem:[%s3323_s30 + $0x260] sm:$0xff] }
  0xad   : > { %2994 = vmatpush3.bf16.xpose.msk.msra.mxu0 %vm3292_vm1, %v2989_v30  ;;  %2662 = vmatmul.mubr.msk.f32.gmra.mrb[24].mxu1 %vm396_vm0, %v261_v45  ;;  %v289_v30 = vld [vmem:[%s3323_s30 + $0x2a8] sm:$0xff] }
  0xae   : > { %3042 = vmatpush3.bf16.xpose.msk.msra.mxu1 %vm3292_vm1, %v3037_v32  ;;  %2997 = vmatprep.subr.msk.bf16.mxu0 %vm3292_vm1, %v2995_v44  ;;  %v290_v32 = vld [vmem:[%s3323_s30 + $0x2b0] sm:$0xff]  ;;  %v281_v45 = vld [vmem:[%s3323_s30 + $0x268] sm:$0xff] }
  0xaf   : > { %3045 = vmatprep.subr.msk.bf16.mxu1 %vm3292_vm1, %v3043_v46  ;;  %2608 = vmatprep.mubr.msk.f32.mxu0 %vm396_vm0, %v246_v47  ;;  %v282_v47 = vld [vmem:[%s3323_s30 + $0x270] sm:$0xff] }
  0xb0   : > { %2664 = vmatprep.mubr.msk.f32.mxu1 %vm396_vm0, %v262_v48  ;;  %2609 = vmatmul.mubr.msk.f32.gmra.mrb[26].mxu0 %vm396_vm0, %v247_v49  ;;  %v298_v48 = vld [vmem:[%s3323_s30 + $0x2f0] sm:$0xff]  ;;  %v283_v49 = vld [vmem:[%s3323_s30 + $0x278] sm:$0xff] }
  0xb1   : > { %2665 = vmatmul.mubr.msk.f32.gmra.mrb[26].mxu1 %vm396_vm0, %v263_v50  ;;  %2611 = vmatprep.mubr.msk.f32.mxu0 %vm396_vm0, %v248_v51  ;;  %v299_v50 = vld [vmem:[%s3323_s30 + $0x2f8] sm:$0xff] }
  0xb2   : > { %2667 = vmatprep.mubr.msk.f32.mxu1 %vm396_vm0, %v264_v54 }
  0xb4   : > { %2612 = vmatmul.mubr.msk.f32.gmra.mrb[28].mxu0 %vm396_vm0, %v249_v57 }
  0xb5   : > { %3000 = vmatpush3.bf16.xpose.msk.msra.mxu0 %vm3292_vm1, %v2995_v44  ;;  %2668 = vmatmul.mubr.msk.f32.gmra.mrb[28].mxu1 %vm396_vm0, %v265_v59  ;;  %v296_v44 = vld [vmem:[%s3323_s30 + $0x2e0] sm:$0xff] }
  0xb6   : > { %3048 = vmatpush3.bf16.xpose.msk.msra.mxu1 %vm3292_vm1, %v3043_v46  ;;  %3003 = vmatprep.subr.msk.bf16.mxu0 %vm3292_vm1, %v3001_v58  ;;  %v297_v46 = vld [vmem:[%s3323_s30 + $0x2e8] sm:$0xff] }
  0xb7   : > { %3051 = vmatprep.subr.msk.bf16.mxu1 %vm3292_vm1, %v3049_v60  ;;  %2614 = vmatprep.mubr.msk.f32.mxu0 %vm396_vm0, %v250_v61 }
  0xb8   : > { %2670 = vmatprep.mubr.msk.f32.mxu1 %vm396_vm0, %v266_v62  ;;  %2615 = vmatmul.mubr.msk.f32.gmra.mrb[30].mxu0 %vm396_vm0, %v251_v63 }
  0xb9   : > { %2671 = vmatmul.mubr.msk.f32.gmra.mrb[30].mxu1 %vm396_vm0, %v267_v1  ;;  %2705 = vmatprep.mubr.msk.f32.mxu0 %vm396_vm0, %v268_v2 }
  0xba   : > { %2761 = vmatprep.mubr.msk.f32.mxu1 %vm396_vm0, %v284_v5 }
  0xbd   : > { %3006 = vmatpush3.bf16.xpose.msk.msra.mxu0 %vm3292_vm1, %v3001_v58 }
  0xbe   : > { %3054 = vmatpush3.bf16.xpose.msk.msra.mxu1 %vm3292_vm1, %v3049_v60  ;;  %3009 = vmatprep.subr.msk.bf16.mxu0 %vm3292_vm1, %v3007_v8 }
  0xbf   : > { %3057 = vmatprep.subr.msk.bf16.mxu1 %vm3292_vm1, %v3055_v9 }
  0xc5   : > { %3012 = vmatpush3.bf16.xpose.msk.msra.mxu0 %vm3292_vm1, %v3007_v8 }
  0xc6   : > { %3060 = vmatpush3.bf16.xpose.msk.msra.mxu1 %vm3292_vm1, %v3055_v9  ;;  %3015 = vmatprep.subr.msk.bf16.mxu0 %vm3292_vm1, %v3013_v14 }
  0xc7   : > { %3063 = vmatprep.subr.msk.bf16.mxu1 %vm3292_vm1, %v3061_v15 }
  0xcd   : > { %3018 = vmatpush3.bf16.xpose.msk.msra.mxu0 %vm3292_vm1, %v3013_v14 }
  0xce   : > { %3066 = vmatpush3.bf16.xpose.msk.msra.mxu1 %vm3292_vm1, %v3061_v15  ;;  %3021 = vmatprep.subr.msk.bf16.mxu0 %vm3292_vm1, %v3019_v20 }
  0xcf   : > { %3069 = vmatprep.subr.msk.bf16.mxu1 %vm3292_vm1, %v3067_v21 }
  0xd5   : > { %3024 = vmatpush3.bf16.xpose.msk.msra.mxu0 %vm3292_vm1, %v3019_v20 }
  0xd6   : > { %3072 = vmatpush3.bf16.xpose.msk.msra.mxu1 %vm3292_vm1, %v3067_v21 }
  0xdc   : > { %2706 = vmatmul.mubr.msk.f32.vlgmr.msra.gmra.mrb[32].mxu0 %vm396_vm0, %v269_v22 }
  0xdd   : > { %2762 = vmatmul.mubr.msk.f32.vlgmr.msra.gmra.mrb[32].mxu1 %vm396_vm0, %v285_v23  ;;  %2708 = vmatprep.mubr.msk.f32.mxu0 %vm396_vm0, %v270_v24 }
  0xde   : > { %2764 = vmatprep.mubr.msk.f32.mxu1 %vm396_vm0, %v286_v25 }
  0xe0   : > { %2709 = vmatmul.mubr.msk.f32.gmra.mrb[34].mxu0 %vm396_vm0, %v271_v26 }
  0xe1   : > { %2765 = vmatmul.mubr.msk.f32.gmra.mrb[34].mxu1 %vm396_vm0, %v287_v0  ;;  %2711 = vmatprep.mubr.msk.f32.mxu0 %vm396_vm0, %v272_v27 }
  0xe2   : > { %2767 = vmatprep.mubr.msk.f32.mxu1 %vm396_vm0, %v288_v28 }
  0xe4   : > { %2712 = vmatmul.mubr.msk.f32.gmra.mrb[36].mxu0 %vm396_vm0, %v273_v29 }
  0xe5   : > { %2768 = vmatmul.mubr.msk.f32.gmra.mrb[36].mxu1 %vm396_vm0, %v289_v30  ;;  %2714 = vmatprep.mubr.msk.f32.mxu0 %vm396_vm0, %v274_v31 }
  0xe6   : > { %2770 = vmatprep.mubr.msk.f32.mxu1 %vm396_vm0, %v290_v32 }
  0xe8   : > { %2715 = vmatmul.mubr.msk.f32.gmra.mrb[38].mxu0 %vm396_vm0, %v275_v33 }
  0xe9   : > { %2771 = vmatmul.mubr.msk.f32.gmra.mrb[38].mxu1 %vm396_vm0, %v291_v34  ;;  %2717 = vmatprep.mubr.msk.f32.mxu0 %vm396_vm0, %v276_v35 }
  0xea   : > { %2773 = vmatprep.mubr.msk.f32.mxu1 %vm396_vm0, %v292_v36 }
  0xec   : > { %2718 = vmatmul.mubr.msk.f32.gmra.mrb[40].mxu0 %vm396_vm0, %v277_v37 }
  0xed   : > { %2774 = vmatmul.mubr.msk.f32.gmra.mrb[40].mxu1 %vm396_vm0, %v293_v38  ;;  %2720 = vmatprep.mubr.msk.f32.mxu0 %vm396_vm0, %v278_v39 }
  0xee   : > { %2776 = vmatprep.mubr.msk.f32.mxu1 %vm396_vm0, %v294_v40 }
  0xf0   : > { %2721 = vmatmul.mubr.msk.f32.gmra.mrb[42].mxu0 %vm396_vm0, %v279_v41 }
  0xf1   : > { %2777 = vmatmul.mubr.msk.f32.gmra.mrb[42].mxu1 %vm396_vm0, %v295_v42  ;;  %2723 = vmatprep.mubr.msk.f32.mxu0 %vm396_vm0, %v280_v43 }
  0xf2   : > { %2779 = vmatprep.mubr.msk.f32.mxu1 %vm396_vm0, %v296_v44 }
  0xf4   : > { %2724 = vmatmul.mubr.msk.f32.gmra.mrb[44].mxu0 %vm396_vm0, %v281_v45 }
  0xf5   : > { %2780 = vmatmul.mubr.msk.f32.gmra.mrb[44].mxu1 %vm396_vm0, %v297_v46  ;;  %2726 = vmatprep.mubr.msk.f32.mxu0 %vm396_vm0, %v282_v47 }
  0xf6   : > { %2782 = vmatprep.mubr.msk.f32.mxu1 %vm396_vm0, %v298_v48 }
  0xf8   : > { %2727 = vmatmul.mubr.msk.f32.gmra.mrb[46].mxu0 %vm396_vm0, %v283_v49 }
  0xf9   : > { %2783 = vmatmul.mubr.msk.f32.gmra.mrb[46].mxu1 %vm396_vm0, %v299_v50 }
 0x12f   : > { %v2483_v51 = vpop.f32.mrb[0].mxu0 }
 0x130   : > { %1844 = vst [vmem:[%s3784_s5 + $0x8] sm:$0xff] %v2483_v51  ;;  %v2539_v52 = vpop.f32.mrb[0].mxu1  ;;  %v559_v53 = vpop.f32.mrb[1].mxu0 }
 0x131   : > { %1860 = vst [vmem:[%s3784_s5 + $0x88] sm:$0xff] %v2539_v52  ;;  %1843 = vst [vmem:[%s3784_s5] sm:$0xff] %v559_v53  ;;  %v800_v54 = vpop.f32.mrb[1].mxu1 }
 0x132   : > { %1859 = vst [vmem:[%s3784_s5 + $0x80] sm:$0xff] %v800_v54 }
 0x133   : > { %v2486_v55 = vpop.f32.mrb[2].mxu0 }
 0x134   : > { %1846 = vst [vmem:[%s3784_s5 + $0x18] sm:$0xff] %v2486_v55  ;;  %v2542_v56 = vpop.f32.mrb[2].mxu1  ;;  %v569_v57 = vpop.f32.mrb[3].mxu0 }
 0x135   : > { %1862 = vst [vmem:[%s3784_s5 + $0x98] sm:$0xff] %v2542_v56  ;;  %1845 = vst [vmem:[%s3784_s5 + $0x10] sm:$0xff] %v569_v57  ;;  %v810_v58 = vpop.f32.mrb[3].mxu1 }
 0x136   : > { %1861 = vst [vmem:[%s3784_s5 + $0x90] sm:$0xff] %v810_v58 }
 0x137   : > { %v2489_v59 = vpop.f32.mrb[4].mxu0 }
 0x138   : > { %1848 = vst [vmem:[%s3784_s5 + $0x28] sm:$0xff] %v2489_v59  ;;  %v2545_v60 = vpop.f32.mrb[4].mxu1  ;;  %v579_v61 = vpop.f32.mrb[5].mxu0 }
 0x139   : > { %1864 = vst [vmem:[%s3784_s5 + $0xa8] sm:$0xff] %v2545_v60  ;;  %1847 = vst [vmem:[%s3784_s5 + $0x20] sm:$0xff] %v579_v61  ;;  %v820_v62 = vpop.f32.mrb[5].mxu1 }
 0x13a   : > { %1863 = vst [vmem:[%s3784_s5 + $0xa0] sm:$0xff] %v820_v62 }
 0x13b   : > { %v2492_v63 = vpop.f32.mrb[6].mxu0 }
 0x13c   : > { %1850 = vst [vmem:[%s3784_s5 + $0x38] sm:$0xff] %v2492_v63  ;;  %v2548_v1 = vpop.f32.mrb[6].mxu1  ;;  %v589_v2 = vpop.f32.mrb[7].mxu0 }
 0x13d   : > { %1866 = vst [vmem:[%s3784_s5 + $0xb8] sm:$0xff] %v2548_v1  ;;  %1849 = vst [vmem:[%s3784_s5 + $0x30] sm:$0xff] %v589_v2  ;;  %v830_v3 = vpop.f32.mrb[7].mxu1 }
 0x13e   : > { %1865 = vst [vmem:[%s3784_s5 + $0xb0] sm:$0xff] %v830_v3 }
 0x13f   : > { %v2495_v4 = vpop.f32.mrb[8].mxu0 }
 0x140   : > { %1852 = vst [vmem:[%s3784_s5 + $0x48] sm:$0xff] %v2495_v4  ;;  %v2551_v5 = vpop.f32.mrb[8].mxu1  ;;  %v599_v6 = vpop.f32.mrb[9].mxu0 }
 0x141   : > { %1868 = vst [vmem:[%s3784_s5 + $0xc8] sm:$0xff] %v2551_v5  ;;  %1851 = vst [vmem:[%s3784_s5 + $0x40] sm:$0xff] %v599_v6  ;;  %v840_v7 = vpop.f32.mrb[9].mxu1 }
 0x142   : > { %1867 = vst [vmem:[%s3784_s5 + $0xc0] sm:$0xff] %v840_v7 }
 0x143   : > { %v2498_v8 = vpop.f32.mrb[10].mxu0 }
 0x144   : > { %1854 = vst [vmem:[%s3784_s5 + $0x58] sm:$0xff] %v2498_v8  ;;  %v2554_v9 = vpop.f32.mrb[10].mxu1  ;;  %v609_v10 = vpop.f32.mrb[11].mxu0 }
 0x145   : > { %1870 = vst [vmem:[%s3784_s5 + $0xd8] sm:$0xff] %v2554_v9  ;;  %1853 = vst [vmem:[%s3784_s5 + $0x50] sm:$0xff] %v609_v10  ;;  %v850_v11 = vpop.f32.mrb[11].mxu1 }
 0x146   : > { %1869 = vst [vmem:[%s3784_s5 + $0xd0] sm:$0xff] %v850_v11 }
 0x147   : > { %v2501_v12 = vpop.f32.mrb[12].mxu0 }
 0x148   : > { %1856 = vst [vmem:[%s3784_s5 + $0x68] sm:$0xff] %v2501_v12  ;;  %v2557_v13 = vpop.f32.mrb[12].mxu1  ;;  %v619_v14 = vpop.f32.mrb[13].mxu0 }
 0x149   : > { %1872 = vst [vmem:[%s3784_s5 + $0xe8] sm:$0xff] %v2557_v13  ;;  %1855 = vst [vmem:[%s3784_s5 + $0x60] sm:$0xff] %v619_v14  ;;  %v860_v15 = vpop.f32.mrb[13].mxu1 }
 0x14a   : > { %1871 = vst [vmem:[%s3784_s5 + $0xe0] sm:$0xff] %v860_v15 }
 0x14b   : > { %v2504_v16 = vpop.f32.mrb[14].mxu0 }
 0x14c   : > { %1858 = vst [vmem:[%s3784_s5 + $0x78] sm:$0xff] %v2504_v16  ;;  %v2560_v17 = vpop.f32.mrb[14].mxu1  ;;  %v629_v18 = vpop.f32.mrb[15].mxu0 }
 0x14d   : > { %1874 = vst [vmem:[%s3784_s5 + $0xf8] sm:$0xff] %v2560_v17  ;;  %1857 = vst [vmem:[%s3784_s5 + $0x70] sm:$0xff] %v629_v18  ;;  %v870_v19 = vpop.f32.mrb[15].mxu1 }
 0x14e   : > { %1873 = vst [vmem:[%s3784_s5 + $0xf0] sm:$0xff] %v870_v19 }
 0x16f   : > { %v2595_v20 = vpop.f32.mrb[16].mxu0 }
 0x170   : > { %1876 = vst [vmem:[%s3784_s5 + $0x108] sm:$0xff] %v2595_v20  ;;  %v2651_v21 = vpop.f32.mrb[16].mxu1  ;;  %v1041_v22 = vpop.f32.mrb[17].mxu0 }
 0x171   : > { %1892 = vst [vmem:[%s3784_s5 + $0x188] sm:$0xff] %v2651_v21  ;;  %1875 = vst [vmem:[%s3784_s5 + $0x100] sm:$0xff] %v1041_v22  ;;  %v1282_v23 = vpop.f32.mrb[17].mxu1 }
 0x172   : > { %1891 = vst [vmem:[%s3784_s5 + $0x180] sm:$0xff] %v1282_v23 }
 0x173   : > { %v2598_v24 = vpop.f32.mrb[18].mxu0 }
 0x174   : > { %1878 = vst [vmem:[%s3784_s5 + $0x118] sm:$0xff] %v2598_v24  ;;  %v2654_v25 = vpop.f32.mrb[18].mxu1  ;;  %v1051_v26 = vpop.f32.mrb[19].mxu0 }
 0x175   : > { %1894 = vst [vmem:[%s3784_s5 + $0x198] sm:$0xff] %v2654_v25  ;;  %1877 = vst [vmem:[%s3784_s5 + $0x110] sm:$0xff] %v1051_v26  ;;  %v1292_v0 = vpop.f32.mrb[19].mxu1 }
 0x176   : > { %1893 = vst [vmem:[%s3784_s5 + $0x190] sm:$0xff] %v1292_v0 }
 0x177   : > { %v2601_v27 = vpop.f32.mrb[20].mxu0 }
 0x178   : > { %1880 = vst [vmem:[%s3784_s5 + $0x128] sm:$0xff] %v2601_v27  ;;  %v2657_v28 = vpop.f32.mrb[20].mxu1  ;;  %v1061_v29 = vpop.f32.mrb[21].mxu0 }
 0x179   : > { %1896 = vst [vmem:[%s3784_s5 + $0x1a8] sm:$0xff] %v2657_v28  ;;  %1879 = vst [vmem:[%s3784_s5 + $0x120] sm:$0xff] %v1061_v29  ;;  %v1302_v30 = vpop.f32.mrb[21].mxu1 }
 0x17a   : > { %1895 = vst [vmem:[%s3784_s5 + $0x1a0] sm:$0xff] %v1302_v30 }
 0x17b   : > { %v2604_v31 = vpop.f32.mrb[22].mxu0 }
 0x17c   : > { %1882 = vst [vmem:[%s3784_s5 + $0x138] sm:$0xff] %v2604_v31  ;;  %v2660_v32 = vpop.f32.mrb[22].mxu1  ;;  %v1071_v33 = vpop.f32.mrb[23].mxu0 }
 0x17d   : > { %1898 = vst [vmem:[%s3784_s5 + $0x1b8] sm:$0xff] %v2660_v32  ;;  %1881 = vst [vmem:[%s3784_s5 + $0x130] sm:$0xff] %v1071_v33  ;;  %v1312_v34 = vpop.f32.mrb[23].mxu1 }
 0x17e   : > { %1897 = vst [vmem:[%s3784_s5 + $0x1b0] sm:$0xff] %v1312_v34 }
 0x17f   : > { %v2607_v35 = vpop.f32.mrb[24].mxu0 }
 0x180   : > { %1884 = vst [vmem:[%s3784_s5 + $0x148] sm:$0xff] %v2607_v35  ;;  %v2663_v36 = vpop.f32.mrb[24].mxu1  ;;  %v1081_v37 = vpop.f32.mrb[25].mxu0 }
 0x181   : > { %1900 = vst [vmem:[%s3784_s5 + $0x1c8] sm:$0xff] %v2663_v36  ;;  %1883 = vst [vmem:[%s3784_s5 + $0x140] sm:$0xff] %v1081_v37  ;;  %v1322_v38 = vpop.f32.mrb[25].mxu1 }
 0x182   : > { %1899 = vst [vmem:[%s3784_s5 + $0x1c0] sm:$0xff] %v1322_v38 }
 0x183   : > { %v2610_v39 = vpop.f32.mrb[26].mxu0 }
 0x184   : > { %1886 = vst [vmem:[%s3784_s5 + $0x158] sm:$0xff] %v2610_v39  ;;  %v2666_v40 = vpop.f32.mrb[26].mxu1  ;;  %v1091_v41 = vpop.f32.mrb[27].mxu0 }
 0x185   : > { %1902 = vst [vmem:[%s3784_s5 + $0x1d8] sm:$0xff] %v2666_v40  ;;  %1885 = vst [vmem:[%s3784_s5 + $0x150] sm:$0xff] %v1091_v41  ;;  %v1332_v42 = vpop.f32.mrb[27].mxu1 }
 0x186   : > { %1901 = vst [vmem:[%s3784_s5 + $0x1d0] sm:$0xff] %v1332_v42 }
 0x187   : > { %v2613_v43 = vpop.f32.mrb[28].mxu0 }
 0x188   : > { %1888 = vst [vmem:[%s3784_s5 + $0x168] sm:$0xff] %v2613_v43  ;;  %v2669_v44 = vpop.f32.mrb[28].mxu1  ;;  %v1101_v45 = vpop.f32.mrb[29].mxu0 }
 0x189   : > { %1904 = vst [vmem:[%s3784_s5 + $0x1e8] sm:$0xff] %v2669_v44  ;;  %1887 = vst [vmem:[%s3784_s5 + $0x160] sm:$0xff] %v1101_v45  ;;  %v1342_v46 = vpop.f32.mrb[29].mxu1 }
 0x18a   : > { %1903 = vst [vmem:[%s3784_s5 + $0x1e0] sm:$0xff] %v1342_v46 }
 0x18b   : > { %v2616_v47 = vpop.f32.mrb[30].mxu0 }
 0x18c   : > { %1890 = vst [vmem:[%s3784_s5 + $0x178] sm:$0xff] %v2616_v47  ;;  %v2672_v48 = vpop.f32.mrb[30].mxu1  ;;  %v1111_v49 = vpop.f32.mrb[31].mxu0 }
 0x18d   : > { %1906 = vst [vmem:[%s3784_s5 + $0x1f8] sm:$0xff] %v2672_v48  ;;  %1889 = vst [vmem:[%s3784_s5 + $0x170] sm:$0xff] %v1111_v49  ;;  %v1352_v50 = vpop.f32.mrb[31].mxu1 }
 0x18e   : > { %1905 = vst [vmem:[%s3784_s5 + $0x1f0] sm:$0xff] %v1352_v50 }
 0x1af   : > { %v2707_v51 = vpop.f32.mrb[32].mxu0 }
 0x1b0   : > { %1908 = vst [vmem:[%s3784_s5 + $0x208] sm:$0xff] %v2707_v51  ;;  %v2763_v52 = vpop.f32.mrb[32].mxu1  ;;  %v1523_v53 = vpop.f32.mrb[33].mxu0 }
 0x1b1   : > { %1924 = vst [vmem:[%s3784_s5 + $0x288] sm:$0xff] %v2763_v52  ;;  %1907 = vst [vmem:[%s3784_s5 + $0x200] sm:$0xff] %v1523_v53  ;;  %v1764_v54 = vpop.f32.mrb[33].mxu1 }
 0x1b2   : > { %1923 = vst [vmem:[%s3784_s5 + $0x280] sm:$0xff] %v1764_v54 }
 0x1b3   : > { %v2710_v55 = vpop.f32.mrb[34].mxu0 }
 0x1b4   : > { %1910 = vst [vmem:[%s3784_s5 + $0x218] sm:$0xff] %v2710_v55  ;;  %v2766_v56 = vpop.f32.mrb[34].mxu1  ;;  %v1533_v57 = vpop.f32.mrb[35].mxu0 }
 0x1b5   : > { %1926 = vst [vmem:[%s3784_s5 + $0x298] sm:$0xff] %v2766_v56  ;;  %1909 = vst [vmem:[%s3784_s5 + $0x210] sm:$0xff] %v1533_v57  ;;  %v1774_v58 = vpop.f32.mrb[35].mxu1 }
 0x1b6   : > { %1925 = vst [vmem:[%s3784_s5 + $0x290] sm:$0xff] %v1774_v58 }
 0x1b7   : > { %v2713_v59 = vpop.f32.mrb[36].mxu0 }
 0x1b8   : > { %1912 = vst [vmem:[%s3784_s5 + $0x228] sm:$0xff] %v2713_v59  ;;  %v2769_v60 = vpop.f32.mrb[36].mxu1  ;;  %v1543_v61 = vpop.f32.mrb[37].mxu0 }
 0x1b9   : > { %1928 = vst [vmem:[%s3784_s5 + $0x2a8] sm:$0xff] %v2769_v60  ;;  %1911 = vst [vmem:[%s3784_s5 + $0x220] sm:$0xff] %v1543_v61  ;;  %v1784_v62 = vpop.f32.mrb[37].mxu1 }
 0x1ba   : > { %1927 = vst [vmem:[%s3784_s5 + $0x2a0] sm:$0xff] %v1784_v62 }
 0x1bb   : > { %v2716_v63 = vpop.f32.mrb[38].mxu0 }
 0x1bc   : > { %1914 = vst [vmem:[%s3784_s5 + $0x238] sm:$0xff] %v2716_v63  ;;  %v2772_v1 = vpop.f32.mrb[38].mxu1  ;;  %v1553_v2 = vpop.f32.mrb[39].mxu0 }
 0x1bd   : > { %1930 = vst [vmem:[%s3784_s5 + $0x2b8] sm:$0xff] %v2772_v1  ;;  %1913 = vst [vmem:[%s3784_s5 + $0x230] sm:$0xff] %v1553_v2  ;;  %v1794_v3 = vpop.f32.mrb[39].mxu1 }
 0x1be   : > { %1929 = vst [vmem:[%s3784_s5 + $0x2b0] sm:$0xff] %v1794_v3 }
 0x1bf   : > { %v2719_v4 = vpop.f32.mrb[40].mxu0 }
 0x1c0   : > { %1916 = vst [vmem:[%s3784_s5 + $0x248] sm:$0xff] %v2719_v4  ;;  %v2775_v5 = vpop.f32.mrb[40].mxu1  ;;  %v1563_v6 = vpop.f32.mrb[41].mxu0 }
 0x1c1   : > { %1932 = vst [vmem:[%s3784_s5 + $0x2c8] sm:$0xff] %v2775_v5  ;;  %1915 = vst [vmem:[%s3784_s5 + $0x240] sm:$0xff] %v1563_v6  ;;  %v1804_v7 = vpop.f32.mrb[41].mxu1 }
 0x1c2   : > { %1931 = vst [vmem:[%s3784_s5 + $0x2c0] sm:$0xff] %v1804_v7 }
 0x1c3   : > { %v2722_v8 = vpop.f32.mrb[42].mxu0 }
 0x1c4   : > { %1918 = vst [vmem:[%s3784_s5 + $0x258] sm:$0xff] %v2722_v8  ;;  %v2778_v9 = vpop.f32.mrb[42].mxu1  ;;  %v1573_v10 = vpop.f32.mrb[43].mxu0 }
 0x1c5   : > { %1934 = vst [vmem:[%s3784_s5 + $0x2d8] sm:$0xff] %v2778_v9  ;;  %1917 = vst [vmem:[%s3784_s5 + $0x250] sm:$0xff] %v1573_v10  ;;  %v1814_v11 = vpop.f32.mrb[43].mxu1 }
 0x1c6   : > { %1933 = vst [vmem:[%s3784_s5 + $0x2d0] sm:$0xff] %v1814_v11 }
 0x1c7   : > { %v2725_v12 = vpop.f32.mrb[44].mxu0 }
 0x1c8   : > { %1920 = vst [vmem:[%s3784_s5 + $0x268] sm:$0xff] %v2725_v12  ;;  %v2781_v13 = vpop.f32.mrb[44].mxu1  ;;  %v1583_v14 = vpop.f32.mrb[45].mxu0 }
 0x1c9   : > { %1936 = vst [vmem:[%s3784_s5 + $0x2e8] sm:$0xff] %v2781_v13  ;;  %1919 = vst [vmem:[%s3784_s5 + $0x260] sm:$0xff] %v1583_v14  ;;  %v1824_v15 = vpop.f32.mrb[45].mxu1 }
 0x1ca   : > { %1935 = vst [vmem:[%s3784_s5 + $0x2e0] sm:$0xff] %v1824_v15 }
 0x1cb   : > { %v2728_v16 = vpop.f32.mrb[46].mxu0 }
 0x1cc   : > { %1922 = vst [vmem:[%s3784_s5 + $0x278] sm:$0xff] %v2728_v16  ;;  %v2784_v17 = vpop.f32.mrb[46].mxu1  ;;  %v1593_v18 = vpop.f32.mrb[47].mxu0 }
 0x1cd   : > { %1938 = vst [vmem:[%s3784_s5 + $0x2f8] sm:$0xff] %v2784_v17  ;;  %1921 = vst [vmem:[%s3784_s5 + $0x270] sm:$0xff] %v1593_v18  ;;  %v1834_v19 = vpop.f32.mrb[47].mxu1 }
 0x1ce   : > { %1937 = vst [vmem:[%s3784_s5 + $0x2f0] sm:$0xff] %v1834_v19 }
 0x1cf   : > { %3144 = shalt.err (!%p3141_p5)
}
 0x1d0   : > { %s3145_s25 = scalar_lea.hbm %s3883_s16, 12288  ;;  %s3149_s28 = scalar_lea.hbm %s3941_s2, 24576 }
 0x1d1   : > { %p3146_p6 = scmp.ne.s32.totalorder %s3883_s16, %s3145_s25  ;;  %p3150_p10 = scmp.lt.u32.totalorder %s3883_s16, %s3941_s2 }
 0x1d2   : > { %p3151_p11 = scmp.lt.u32.totalorder %s3149_s28, %s3145_s25  ;;  %p3153_p13 = scmp.lt.u32.totalorder %s3145_s25, %s3883_s16 }
 0x1d3   : > { %p3147_p7 = pnand %p3146_p6, %p3269_p4 }
 0x1d4   : > { %p3152_p12 = por %p3151_p11, %p3150_p10 }
 0x1d5   : > { %p3148_p9 = pneg %p3147_p7 }
 0x1d6   : > { %p3154_p0 = por %p3153_p13, %p3152_p12 }
 0x1d8   : > { %p3155_p1 = pnand %p3154_p0, %p3148_p9 }
 0x1da   : > { %3158 = shalt.err (!%p3155_p1)
}
 0x1db   : > { %s3212_s3 = smov 128   ;;  %s3213_s4 = smov 8  }
 0x1dc   : > { %3074 = dma.vmem_to_hbm [thread:$0]  (%p3269_p4), %s3885_s7, 12288, %s3883_s16, %s3893_s12, %s3212_s3, %s3212_s3, %s3213_s4  }
 0x1dd PF: > { %p3080_p2 = scmp.ge.s32.totalorder %s3209_s14, 2  ;;  %s1971_s5 = sand.u32 1, %s3189_s9  }
 0x1de   : > { %s1972_s6 = scalar_lea.sflag [#allocation3], %s1971_s5 }
 0x1df   : > { %p3077_p3 = pnand %p3080_p2, %p3276_p8 }
 0x1e1   : > { %3184 = dma.done.wait (!%p3077_p3), %s1972_s6, 12288  }
 0x1e2   : > { %3186 = vsyncadd (!%p3077_p3), %s1972_s6, 4294955008  ;;  %s15_s14 = sadd.s32 1, %s3209_s14   ;;  %s3946_s9 = smov %s3193_s10 }
 0x1e3   : > { %p12_p5 = scmp.ge.s32.totalorder %s15_s14, 4   ;;  %s3947_s10 = smov %s3197_s11 }
 0x1e4   : > { %s3948_s11 = smov %s3282_s22  ;;  %s3949_s12 = smov %s3205_s13 }
 0x1e5   : > { %s3950_s13 = smov %s3952_s17  ;;  %14 = sbr.rel (!%p12_p5) target bundleno = 4 (0x4), region = 66 }
 0x1ec   :  { %1977 = vsyncpa [#allocation3], 1 }
 0x1ed   :  { %1979 = vsyncpa [#allocation3 + $0x1], 1 }

</bundles_post_ra>
